<compile_context>
chip_gen: v5e
topology: v5e:2x2
jax: 0.10.0
libtpu: 0.0.40
codegen_flags: <defaults>
</compile_context>

<pallas_src>
import numpy as np
import jax
import jax.numpy as jnp
from jax.experimental import pallas as pl
from jax.experimental.pallas import tpu as pltpu


def _predict_loss_kernel(rec_t_ref, vsc_t_ref, sub_full_ref, sub_blk_ref,
                         ksc_t_ref, kuu_mt_ref, ii_ref, out_ref):
    f32 = jnp.float32
    rec_t = rec_t_ref[...]        # [R, TN]  Recommended_m^T (this user block)
    sub_blk = sub_blk_ref[...]    # [S, TN]  Substitute_m^T  (this user block)

    # recommend[i] = sum_r Vscore[i, r] * Recommended_m[i, r]
    recommend = jnp.sum(vsc_t_ref[...] * rec_t, axis=0, keepdims=True)       # [1, TN]

    # substitute[i] = sum_s Kscore[i, s] * Substitute_m[i, s]
    substitute = jnp.sum(ksc_t_ref[...] * sub_blk, axis=0, keepdims=True)    # [1, TN]

    # social[i] = sum_{k != i} KUU[i, k] * (Sub @ Sub^T)[i, k]
    #           = sum_s Sub[i, s] * ((KUU * (1 - I)) @ Sub)[i, s]
    # kuu_mt_ref holds the diagonal-masked KUU, transposed: kuu_mt[k, i] = KUUm[i, k].
    wt = jnp.dot(sub_full_ref[...], kuu_mt_ref[...],
                 preferred_element_type=f32)                                  # [S, TN]
    social = jnp.sum(sub_blk * wt, axis=0, keepdims=True)                     # [1, TN]

    # haptic[i] = sum_s (Recommended_m @ II[:, :R]^T)[i, s] * Substitute_m[i, s]
    ht = jnp.dot(ii_ref[...], rec_t, preferred_element_type=f32)              # [S, TN]
    haptic = jnp.sum(ht * sub_blk, axis=0, keepdims=True)                     # [1, TN]

    out_ref[0:1, :] = recommend
    out_ref[1:2, :] = substitute
    out_ref[2:3, :] = social
    out_ref[3:4, :] = haptic


def predict_loss_train(Recommended_m, Substitute_m, ItemGroups_m, Vid, VUU, KUU,
                       Vscore, Kscore, II, *, max_group_member, block_n=256):
    """Pallas port of Predict_loss_train.forward (returns recommend, substitute,
    social, haptic — each shape [N])."""
    del ItemGroups_m, VUU, Vid, max_group_member  # not used by the forward math

    N, R = Recommended_m.shape
    S = Substitute_m.shape[1]
    f32 = jnp.float32

    # ---- wrapper glue (plain XLA): transposes, KUU eye-mask, II slice ----
    rec_t = jnp.asarray(Recommended_m, f32).T                   # [R, N]
    vsc_t = jnp.asarray(Vscore, f32).T                          # [R, N]
    sub_t = jnp.asarray(Substitute_m, f32).T                    # [S, N]
    ksc_t = jnp.asarray(Kscore, f32).T                          # [S, N]
    kuu = jnp.asarray(KUU, f32)[:N, :N] * (1.0 - jnp.eye(N, dtype=f32))
    kuu_mt = kuu.T                                              # [N, N]; kuu_mt[k, i] = KUUm[i, k]
    ii = jnp.asarray(II, f32)[:, :R]                            # [S, R]

    # ---- tile the user (lane) axis; pad users to a multiple of the tile ----
    tn = N if N <= block_n else block_n
    n_pad = pl.cdiv(N, tn) * tn
    if n_pad != N:
        pad = n_pad - N
        rec_t = jnp.pad(rec_t, ((0, 0), (0, pad)))
        vsc_t = jnp.pad(vsc_t, ((0, 0), (0, pad)))
        sub_t = jnp.pad(sub_t, ((0, 0), (0, pad)))
        ksc_t = jnp.pad(ksc_t, ((0, 0), (0, pad)))
        kuu_mt = jnp.pad(kuu_mt, ((0, pad), (0, pad)))

    out = pl.pallas_call(
        _predict_loss_kernel,
        out_shape=jax.ShapeDtypeStruct((4, n_pad), f32),
        grid=(n_pad // tn,),
        in_specs=[
            pl.BlockSpec((R, tn), lambda i: (0, i)),        # Recommended^T  (user block)
            pl.BlockSpec((R, tn), lambda i: (0, i)),        # Vscore^T       (user block)
            pl.BlockSpec((S, n_pad), lambda i: (0, 0)),     # Substitute^T   (all users, matmul LHS)
            pl.BlockSpec((S, tn), lambda i: (0, i)),        # Substitute^T   (user block)
            pl.BlockSpec((S, tn), lambda i: (0, i)),        # Kscore^T       (user block)
            pl.BlockSpec((n_pad, tn), lambda i: (0, i)),    # masked KUU^T   (column block)
            pl.BlockSpec((S, R), lambda i: (0, 0)),         # II[:, :R]
        ],
        out_specs=pl.BlockSpec((4, tn), lambda i: (0, i)),
        compiler_params=pltpu.CompilerParams(dimension_semantics=("parallel",)),
    )(rec_t, vsc_t, sub_t, sub_t, ksc_t, kuu_mt, ii)

    return out[0, :N], out[1, :N], out[2, :N], out[3, :N]


def _reference_numpy(Recommended_m, Substitute_m, KUU, Vscore, Kscore, II):
    rec = np.asarray(Recommended_m, np.float32)
    sub = np.asarray(Substitute_m, np.float32)
    kuu = np.asarray(KUU, np.float32)
    vsc = np.asarray(Vscore, np.float32)
    ksc = np.asarray(Kscore, np.float32)
    ii = np.asarray(II, np.float32)
    N, R = rec.shape
    recommend = np.sum(vsc * rec, axis=1)
    substitute = np.sum(ksc * sub, axis=1)
    mask = (sub @ sub.T) * (1.0 - np.eye(N, dtype=np.float32))
    social = np.sum(kuu[:N, :N] * mask, axis=1)
    haptic = np.sum((rec @ ii[:, :R].T) * sub, axis=1)
    return recommend, substitute, social, haptic


if __name__ == "__main__":
    key = jax.random.PRNGKey(0)
    N, R, S = 16, 32, 8               # users, recommended items, substitute items
    max_group_member = 4
    R_full = R + 8                    # II has extra columns that the forward slices away
    KUU_full = N + 4                  # KUU is larger than N and gets sliced

    ks = jax.random.split(key, 9)
    Recommended_m = jax.random.normal(ks[0], (N, R), jnp.float32)
    Substitute_m = jax.random.normal(ks[1], (N, S), jnp.float32)
    ItemGroups_m = jax.random.normal(ks[2], (N, S), jnp.float32)            # unused by forward
    Vid = jax.random.randint(ks[3], (max_group_member + R,), 0, N, jnp.int32)  # dead in forward
    VUU = jax.random.normal(ks[4], (KUU_full, KUU_full), jnp.float32)       # unused by forward
    KUU = jax.random.normal(ks[5], (KUU_full, KUU_full), jnp.float32)
    Vscore = jax.random.normal(ks[6], (N, R), jnp.float32)
    Kscore = jax.random.normal(ks[7], (N, S), jnp.float32)
    II = jax.random.normal(ks[8], (S, R_full), jnp.float32)

    outs = predict_loss_train(
        Recommended_m, Substitute_m, ItemGroups_m, Vid, VUU, KUU,
        Vscore, Kscore, II, max_group_member=max_group_member)
    jax.block_until_ready(outs)

    refs = _reference_numpy(Recommended_m, Substitute_m, KUU, Vscore, Kscore, II)
    names = ("recommend", "substitute", "social", "haptic")
    for name, got, ref in zip(names, outs, refs):
        assert np.allclose(np.asarray(got), ref, rtol=2e-2, atol=2e-2), f"{name} mismatch"

    print("KERNEL_OK")
</pallas_src>

<mosaic_0001>
module attributes {stable_mosaic.version = 11 : i64} {
  func.func @_predict_loss_kernel(%arg0: i32, %arg1: memref<32x16xf32, #tpu.memory_space<vmem>>, %arg2: memref<32x16xf32, #tpu.memory_space<vmem>>, %arg3: memref<8x16xf32, #tpu.memory_space<vmem>>, %arg4: memref<8x16xf32, #tpu.memory_space<vmem>>, %arg5: memref<8x16xf32, #tpu.memory_space<vmem>>, %arg6: memref<16x16xf32, #tpu.memory_space<vmem>>, %arg7: memref<8x32xf32, #tpu.memory_space<vmem>>, %arg8: memref<4x16xf32, #tpu.memory_space<vmem>>) attributes {dimension_semantics = [#tpu.dimension_semantics<parallel>], iteration_bounds = array<i64: 1>, scalar_prefetch = 0 : i64, scratch_operands = 0 : i64, tpu.core_type = #tpu.core_type<tc>, window_params = [{transform_indices = @transform_0, window_bounds = array<i64: 32, 16>}, {transform_indices = @transform_1, window_bounds = array<i64: 32, 16>}, {pipeline_mode = #tpu.pipeline_mode<synchronous>, transform_indices = @transform_2, window_bounds = array<i64: 8, 16>}, {transform_indices = @transform_3, window_bounds = array<i64: 8, 16>}, {transform_indices = @transform_4, window_bounds = array<i64: 8, 16>}, {transform_indices = @transform_5, window_bounds = array<i64: 16, 16>}, {pipeline_mode = #tpu.pipeline_mode<synchronous>, transform_indices = @transform_6, window_bounds = array<i64: 8, 32>}, {transform_indices = @transform_7, window_bounds = array<i64: 4, 16>}]} {
    %c0 = arith.constant 0 : index
    %c0_0 = arith.constant 0 : index
    %0 = vector.load %arg1[%c0, %c0_0] : memref<32x16xf32, #tpu.memory_space<vmem>>, vector<32x16xf32>
    %c0_1 = arith.constant 0 : index
    %c0_2 = arith.constant 0 : index
    %1 = vector.load %arg4[%c0_1, %c0_2] : memref<8x16xf32, #tpu.memory_space<vmem>>, vector<8x16xf32>
    %c0_3 = arith.constant 0 : index
    %c0_4 = arith.constant 0 : index
    %2 = vector.load %arg2[%c0_3, %c0_4] : memref<32x16xf32, #tpu.memory_space<vmem>>, vector<32x16xf32>
    %3 = arith.mulf %2, %0 : vector<32x16xf32>
    %cst = arith.constant dense<0.000000e+00> : vector<16xf32>
    %4 = vector.multi_reduction <add>, %3, %cst [0] : vector<32x16xf32> to vector<16xf32>
    %5 = vector.shape_cast %4 : vector<16xf32> to vector<1x16xf32>
    %c0_5 = arith.constant 0 : index
    %c0_6 = arith.constant 0 : index
    %6 = vector.load %arg5[%c0_5, %c0_6] : memref<8x16xf32, #tpu.memory_space<vmem>>, vector<8x16xf32>
    %7 = arith.mulf %6, %1 : vector<8x16xf32>
    %cst_7 = arith.constant dense<0.000000e+00> : vector<16xf32>
    %8 = vector.multi_reduction <add>, %7, %cst_7 [0] : vector<8x16xf32> to vector<16xf32>
    %9 = vector.shape_cast %8 : vector<16xf32> to vector<1x16xf32>
    %c0_8 = arith.constant 0 : index
    %c0_9 = arith.constant 0 : index
    %10 = vector.load %arg3[%c0_8, %c0_9] : memref<8x16xf32, #tpu.memory_space<vmem>>, vector<8x16xf32>
    %c0_10 = arith.constant 0 : index
    %c0_11 = arith.constant 0 : index
    %11 = vector.load %arg6[%c0_10, %c0_11] : memref<16x16xf32, #tpu.memory_space<vmem>>, vector<16x16xf32>
    %cst_12 = arith.constant dense<0.000000e+00> : vector<8x16xf32>
    %12 = tpu.matmul %10, %11, %cst_12 {dimension_numbers = #tpu.dot_dimension_numbers<[1], [0], [0], [1], [0, 0, 1, 1], [], []>} : vector<8x16xf32>, vector<16x16xf32>, vector<8x16xf32> -> vector<8x16xf32>
    %13 = arith.mulf %1, %12 : vector<8x16xf32>
    %cst_13 = arith.constant dense<0.000000e+00> : vector<16xf32>
    %14 = vector.multi_reduction <add>, %13, %cst_13 [0] : vector<8x16xf32> to vector<16xf32>
    %15 = vector.shape_cast %14 : vector<16xf32> to vector<1x16xf32>
    %c0_14 = arith.constant 0 : index
    %c0_15 = arith.constant 0 : index
    %16 = vector.load %arg7[%c0_14, %c0_15] : memref<8x32xf32, #tpu.memory_space<vmem>>, vector<8x32xf32>
    %cst_16 = arith.constant dense<0.000000e+00> : vector<8x16xf32>
    %17 = tpu.matmul %16, %0, %cst_16 {dimension_numbers = #tpu.dot_dimension_numbers<[1], [0], [0], [1], [0, 0, 1, 1], [], []>} : vector<8x32xf32>, vector<32x16xf32>, vector<8x16xf32> -> vector<8x16xf32>
    %18 = arith.mulf %17, %1 : vector<8x16xf32>
    %cst_17 = arith.constant dense<0.000000e+00> : vector<16xf32>
    %19 = vector.multi_reduction <add>, %18, %cst_17 [0] : vector<8x16xf32> to vector<16xf32>
    %20 = vector.shape_cast %19 : vector<16xf32> to vector<1x16xf32>
    %c0_18 = arith.constant 0 : index
    %c0_19 = arith.constant 0 : index
    %21 = vector.load %arg8[%c0_18, %c0_19] : memref<4x16xf32, #tpu.memory_space<vmem>>, vector<1x16xf32>
    tpu.vector_store %arg8[%c0_18, %c0_19], %5 {strides = array<i32>} : memref<4x16xf32, #tpu.memory_space<vmem>>, vector<1x16xf32>,
    %c1 = arith.constant 1 : index
    %c0_20 = arith.constant 0 : index
    %22 = vector.load %arg8[%c1, %c0_20] : memref<4x16xf32, #tpu.memory_space<vmem>>, vector<1x16xf32>
    tpu.vector_store %arg8[%c1, %c0_20], %9 {strides = array<i32>} : memref<4x16xf32, #tpu.memory_space<vmem>>, vector<1x16xf32>,
    %c2 = arith.constant 2 : index
    %c0_21 = arith.constant 0 : index
    %23 = vector.load %arg8[%c2, %c0_21] : memref<4x16xf32, #tpu.memory_space<vmem>>, vector<1x16xf32>
    tpu.vector_store %arg8[%c2, %c0_21], %15 {strides = array<i32>} : memref<4x16xf32, #tpu.memory_space<vmem>>, vector<1x16xf32>,
    %c3 = arith.constant 3 : index
    %c0_22 = arith.constant 0 : index
    %24 = vector.load %arg8[%c3, %c0_22] : memref<4x16xf32, #tpu.memory_space<vmem>>, vector<1x16xf32>
    tpu.vector_store %arg8[%c3, %c0_22], %20 {strides = array<i32>} : memref<4x16xf32, #tpu.memory_space<vmem>>, vector<1x16xf32>,
    return
  }
  func.func @transform_0(%arg0: i32) -> (i32, i32) {
    %c0_i32 = arith.constant 0 : i32
    %c0_i32_0 = arith.constant 0 : i32
    return %c0_i32, %arg0 : i32, i32
  }
  func.func @transform_1(%arg0: i32) -> (i32, i32) {
    %c0_i32 = arith.constant 0 : i32
    %c0_i32_0 = arith.constant 0 : i32
    return %c0_i32, %arg0 : i32, i32
  }
  func.func @transform_2(%arg0: i32) -> (i32, i32) {
    %c0_i32 = arith.constant 0 : i32
    %c0_i32_0 = arith.constant 0 : i32
    %c0_i32_1 = arith.constant 0 : i32
    return %c0_i32, %c0_i32_0 : i32, i32
  }
  func.func @transform_3(%arg0: i32) -> (i32, i32) {
    %c0_i32 = arith.constant 0 : i32
    %c0_i32_0 = arith.constant 0 : i32
    return %c0_i32, %arg0 : i32, i32
  }
  func.func @transform_4(%arg0: i32) -> (i32, i32) {
    %c0_i32 = arith.constant 0 : i32
    %c0_i32_0 = arith.constant 0 : i32
    return %c0_i32, %arg0 : i32, i32
  }
  func.func @transform_5(%arg0: i32) -> (i32, i32) {
    %c0_i32 = arith.constant 0 : i32
    %c0_i32_0 = arith.constant 0 : i32
    return %c0_i32, %arg0 : i32, i32
  }
  func.func @transform_6(%arg0: i32) -> (i32, i32) {
    %c0_i32 = arith.constant 0 : i32
    %c0_i32_0 = arith.constant 0 : i32
    %c0_i32_1 = arith.constant 0 : i32
    return %c0_i32, %c0_i32_0 : i32, i32
  }
  func.func @transform_7(%arg0: i32) -> (i32, i32) {
    %c0_i32 = arith.constant 0 : i32
    %c0_i32_0 = arith.constant 0 : i32
    return %c0_i32, %arg0 : i32, i32
  }
}

</mosaic_0001>

<bundles_post_ra>
// kernel: tpu_custom_call.1
= control target key start
LH: loop header
LB: loop body
LE: loop exit
PB: predicated region body
PF: predicated region fallthrough
CT: control target
= control target key end

     0   :  { %vm40_vm0 = vcmask 130048   ;;  %s278_s0 = inlined_call_operand.vmem [shape: f32[32,16], index: 0, kind: input, shape index: {}]   ;;  %s279_s1 = inlined_call_operand.vmem [shape: f32[32,16], index: 1, kind: input, shape index: {}]   ;;  %s280_s2 = inlined_call_operand.vmem [shape: f32[8,16], index: 2, kind: input, shape index: {}]   ;;  %s281_s3 = inlined_call_operand.vmem [shape: f32[8,16], index: 3, kind: input, shape index: {}]   ;;  %s282_s4 = inlined_call_operand.vmem [shape: f32[8,16], index: 4, kind: input, shape index: {}]   ;;  %s283_s5 = inlined_call_operand.vmem [shape: f32[16,16], index: 5, kind: input, shape index: {}]   ;;  %s284_s6 = inlined_call_operand.vmem [shape: f32[8,32], index: 6, kind: input, shape index: {}]   ;;  %s285_s7 = inlined_call_operand.hbm [shape: f32[4,16], index: 7, kind: output, shape index: {}]  }
   0x1   :  { %v65_v0 = vld [vmem:[%s283_s5 + $0x8] sm:$0xff]  ;;  %v30_v1 = vld [vmem:[%s278_s0 + $0x18] sm:$0xff]  ;;  %v64_v3 = vld [vmem:[%s283_s5] sm:$0xff] }
   0x2   :  { %v35_v2 = vld [vmem:[%s279_s1 + $0x18] sm:$0xff]  ;;  %83 = vmatpush.msra.mxu0 %v65_v0  ;;  %114 = vmatpush.msra.mxu1 %v30_v1  ;;  %v29_v4 = vld [vmem:[%s278_s0 + $0x10] sm:$0xff]  ;;  %v63_v7 = vld [vmem:[%s280_s2] sm:$0xff] }
   0x3   :  { %v34_v5 = vld [vmem:[%s279_s1 + $0x10] sm:$0xff]  ;;  %v28_v8 = vld [vmem:[%s278_s0 + $0x8] sm:$0xff]  ;;  %v27_v11 = vld [vmem:[%s278_s0] sm:$0xff]  ;;  %v39_v13 = vmul.f32 %v35_v2, %v30_v1 }
   0x4   :  { %v38_v6 = vmul.f32 %v34_v5, %v29_v4  ;;  %v33_v9 = vld [vmem:[%s279_s1 + $0x8] sm:$0xff]  ;;  %84 = vmatpush.msra.mxu0 %v64_v3  ;;  %115 = vmatpush.msra.mxu1 %v29_v4  ;;  %v32_v12 = vld [vmem:[%s279_s1] sm:$0xff] }
   0x5   :  { %v37_v10 = vmul.f32 %v33_v9, %v28_v8  ;;  %151 = vmatmul.msk.f32.vlgmr.msra.gmra.mxu0 %vm40_vm0, %v63_v7  ;;  %v36_v14 = vmul.f32 %v32_v12, %v27_v11 }
   0x6   :  { %12 = vsyncpa [#allocation3], 0  ;;  %116 = vmatpush.msra.mxu1 %v28_v8  ;;  %v97_v16 = vld [vmem:[%s284_s6] sm:$0xff]  ;;  %vm98_vm1 = vcmask 261120   ;;  %v44_v17 = vsel %vm40_vm0, %v38_v6, 0.0  ;;  %v46_v20 = vsel %vm40_vm0, %v39_v13, 0.0 }
   0x7   :  { %v42_v15 = vsel %vm40_vm0, %v37_v10, 0.0  ;;  %v41_v18 = vsel %vm40_vm0, %v36_v14, 0.0  ;;  %v54_v23 = vld [vmem:[%s282_s4] sm:$0xff]  ;;  %vm130_vm2 = vcmask 122880   ;;  %s142_s26 = sshll.u32 %s285_s7, 4  ;;  %s143_s26 = int_to_ptr.hbm [resolvable:$true] %s142_s26 }
   0x8   :  { %v43_v19 = vadd.f32 %v42_v15, %v41_v18  ;;  %117 = vmatpush.msra.mxu1 %v27_v11  ;;  %v31_v24 = vld [vmem:[%s281_s3] sm:$0xff]  ;;  %s180_s3 = smov [#allocation2]  }
   0x9   :  { %152 = vmatmul.msk.f32.vlgmr.msra.gmra.mxu1 %vm98_vm1, %v97_v16  ;;  %v55_v25 = vmul.f32 %v54_v23, %v31_v24  ;;  %s140_s4 = sshll.u32 %s180_s3, 4  ;;  %s141_s4 = int_to_ptr.vmem [resolvable:$true] %s140_s4 }
   0xa   :  { %v45_v21 = vadd.f32 %v44_v17, %v43_v19 }
   0xb   :  { %v56_v26 = vsel %vm40_vm0, %v55_v25, 0.0 }
   0xc   :  { %v47_v22 = vadd.f32 %v46_v20, %v45_v21  ;;  %v57_v27 = vrot.slane %v56_v26, 4 }
   0xe   :  { %v58_v28 = vadd.f32 %v57_v27, %v56_v26  ;;  %v48_v29 = vrot.slane %v47_v22, 4 }
  0x10   :  { %v59_v30 = vrot.slane %v58_v28, 2  ;;  %v49_v31 = vadd.f32 %v48_v29, %v47_v22 }
  0x12   :  { %v60_v32 = vadd.f32 %v59_v30, %v58_v28  ;;  %v50_v33 = vrot.slane %v49_v31, 2 }
  0x14   :  { %v61_v34 = vrot.slane %v60_v32, 1  ;;  %v51_v35 = vadd.f32 %v50_v33, %v49_v31 }
  0x16   :  { %v62_v36 = vadd.f32 %v61_v34, %v60_v32  ;;  %v52_v37 = vrot.slane %v51_v35, 1 }
  0x18   :  { %132 = vst.msk [vmem:[#allocation2 + $0x1] sm:$0x1] %vm130_vm2, %v62_v36  ;;  %v53_v38 = vadd.f32 %v52_v37, %v51_v35 }
  0x1a   :  { %131 = vst.msk [vmem:[#allocation2] sm:$0x1] %vm130_vm2, %v53_v38 }
  0x82   :  { %v86_v39 = vpop.f32.mrf.mxu0 }
  0x83   :  { %v89_v40 = vmul.f32 %v86_v39, %v31_v24 }
  0x85   :  { %v90_v41 = vsel %vm40_vm0, %v89_v40, 0.0 }
  0x86   :  { %v91_v42 = vrot.slane %v90_v41, 4  ;;  %v119_v43 = vpop.f32.mrf.mxu1 }
  0x87   :  { %v122_v44 = vmul.f32 %v119_v43, %v31_v24 }
  0x88   :  { %v92_v45 = vadd.f32 %v91_v42, %v90_v41 }
  0x89   :  { %v123_v46 = vsel %vm40_vm0, %v122_v44, 0.0 }
  0x8a   :  { %v93_v47 = vrot.slane %v92_v45, 2  ;;  %v124_v48 = vrot.slane %v123_v46, 4 }
  0x8c   :  { %v94_v49 = vadd.f32 %v93_v47, %v92_v45  ;;  %v125_v50 = vadd.f32 %v124_v48, %v123_v46 }
  0x8e   :  { %v95_v51 = vrot.slane %v94_v49, 1  ;;  %v126_v52 = vrot.slane %v125_v50, 2 }
  0x90   :  { %v96_v53 = vadd.f32 %v95_v51, %v94_v49  ;;  %v127_v54 = vadd.f32 %v126_v52, %v125_v50 }
  0x92   :  { %133 = vst.msk [vmem:[#allocation2 + $0x2] sm:$0x1] %vm130_vm2, %v96_v53  ;;  %v128_v55 = vrot.slane %v127_v54, 1 }
  0x94   :  { %v129_v56 = vadd.f32 %v128_v55, %v127_v54 }
  0x96   :  { %134 = vst.msk [vmem:[#allocation2 + $0x3] sm:$0x1] %vm130_vm2, %v129_v56 }
  0x97   :  { %145 = dma.vmem_to_hbm [thread:$0]  %s141_s4, 64, %s143_s26, [#allocation3]  }
  0x98   :  { %178 = dma.done.wait [#allocation3], 64  }
  0x99   :  { %179 = vsyncadd [#allocation3], 4294967232 }
  0x9a   :  { %150 = vsyncpa [#allocation3], 1 }

</bundles_post_ra>
